<compile_context>
chip_gen: v7x
topology: tpu7x:2x2x1
jax: 0.10.0
libtpu: 0.0.40
codegen_flags: <defaults>
</compile_context>

<pallas_src>
import math

import jax
import jax.numpy as jnp
from jax import lax
from jax.experimental import pallas as pl
from jax.experimental.pallas import tpu as pltpu

BN_EPS = 1e-5
_LANE = 128


def _vmem_limit_bytes():
    # ~75% of physical VMEM: ~96 MiB on v5e/v6e (128 MiB), ~48 MiB on v7x (64 MiB).
    try:
        cap = int(pltpu.get_tpu_info().vmem_capacity_bytes)
    except Exception:
        cap = 64 * 1024 * 1024          # v7x-safe fallback
    return min(cap * 3 // 4, 100 * 1024 * 1024)


_VMEM_LIMIT = _vmem_limit_bytes()


# ------------------------------- small helpers ------------------------------ #

def _round_up(x, m):
    return (x + m - 1) // m * m


def _pick_th(ho, wo, max_rows):
    """Largest divisor th of `ho` with th*wo <= max_rows; prefer 8-aligned row tiles."""
    fallback = None
    for th in range(ho, 0, -1):
        if ho % th or th * wo > max_rows:
            continue
        if (th * wo) % 8 == 0:
            return th
        if fallback is None:
            fallback = th
    return fallback if fallback is not None else ho


def _pick_tb(g, tm, row_limit):
    """Largest divisor of g whose block (tb*tm rows) fits the row limit."""
    for tb in range(g, 0, -1):
        if g % tb == 0 and tb * tm <= row_limit:
            return tb
    return 1


def _mosaic_params(n_axes):
    return pltpu.CompilerParams(
        dimension_semantics=("parallel",) * n_axes,
        vmem_limit_bytes=_VMEM_LIMIT)


def _pack_weight(w_khwcio, cin_p, cout_p):
    """(KH, KW, Cin, Cout) -> (KH*KW*cin_p, cout_p) bf16, zero channel padding (im2col order)."""
    kh, kw, ci, co = w_khwcio.shape
    w = jnp.pad(w_khwcio, ((0, 0), (0, 0), (0, cin_p - ci), (0, cout_p - co)))
    return w.reshape(kh * kw * cin_p, cout_p).astype(jnp.bfloat16)


# ----------------------- fused conv (+ BN partial stats) -------------------- #

def _make_conv_stats_kernel(KH, KW, th, Wo, cin_p):
    """stride-1 'valid' KHxKW conv on a pre-padded image via im2col scratch + one MXU dot."""

    def kernel(xp_ref, w_ref, y_ref, stats_ref, patch_ref):
        # xp_ref:   (1, Ho+KH-1, Wo+KW-1, cin_p) bf16 -- full padded image, resident/sample
        # w_ref:    (KH*KW*cin_p, cout_p)        bf16 -- resident weights (im2col layout)
        # y_ref:    (1, th*Wo, cout_p)           bf16 -- conv output row-tile
        # stats_ref:(1, 2, cout_p)               f32  -- row0 = sum, row1 = sum of squares
        # patch_ref:(th*Wo, KH*KW*cin_p)         bf16 -- im2col VMEM scratch
        t = pl.program_id(1)
        row0 = pl.multiple_of(t * th, th)

        for ky in range(KH):
            # contiguous row band of the resident padded image (full width, all channels)
            band = xp_ref[0, pl.ds(row0 + ky, th), :, :]           # (th, Wo+KW-1, cin_p)
            for kx in range(KW):
                slot = ky * KW + kx
                # lane-aligned column-slot store (slot*cin_p is a multiple of 128)
                patch_ref[:, slot * cin_p:(slot + 1) * cin_p] = (
                    band[:, kx:kx + Wo, :].reshape(th * Wo, cin_p))

        # one full-K matmul on the MXU, f32 accumulation
        acc = jnp.dot(patch_ref[...], w_ref[...], preferred_element_type=jnp.float32)

        y_ref[...] = acc[None].astype(y_ref.dtype)                 # bf16 writeback
        s = jnp.sum(acc, axis=0, keepdims=True)                    # exact stats from f32 acc
        ss = jnp.sum(acc * acc, axis=0, keepdims=True)
        stats_ref[...] = jnp.concatenate([s, ss], axis=0)[None]

    return kernel


def _conv_bn_stats(xpad, w_mat, KH, KW, Ho, Wo, cout_p, max_rows):
    """Run the fused conv kernel; return y (G, tm, cout_p) bf16 + per-channel sum/sumsq."""
    N, Hp, Wp, cin_p = xpad.shape
    assert Hp == Ho + KH - 1 and Wp == Wo + KW - 1
    K = KH * KW * cin_p
    assert w_mat.shape == (K, cout_p)

    th = _pick_th(Ho, Wo, max_rows)
    T = Ho // th
    tm = th * Wo

    # NOTE(v7x): if a layer config does not fit the smaller 64 MiB VMEM with full-image
    # residency, switch this in_spec to a haloed row-band block; HBM re-reads are cheap there.
    y, stats = pl.pallas_call(
        _make_conv_stats_kernel(KH, KW, th, Wo, cin_p),
        grid=(N, T),
        in_specs=[
            pl.BlockSpec((1, Hp, Wp, cin_p), lambda n, t: (n, 0, 0, 0)),
            pl.BlockSpec((K, cout_p), lambda n, t: (0, 0)),
        ],
        out_specs=(
            pl.BlockSpec((1, tm, cout_p), lambda n, t: (n * T + t, 0, 0)),
            pl.BlockSpec((1, 2, cout_p), lambda n, t: (n * T + t, 0, 0)),
        ),
        out_shape=(
            jax.ShapeDtypeStruct((N * T, tm, cout_p), jnp.bfloat16),
            jax.ShapeDtypeStruct((N * T, 2, cout_p), jnp.float32),
        ),
        scratch_shapes=[pltpu.VMEM((tm, K), jnp.bfloat16)],
        compiler_params=_mosaic_params(2),
    )(xpad, w_mat)

    sums = stats[:, 0, :].sum(axis=0)      # (cout_p,)
    sumsqs = stats[:, 1, :].sum(axis=0)    # (cout_p,)
    return y, sums, sumsqs


# ------------------------------ BN apply kernels ----------------------------- #

def _bn_relu_kernel(y_ref, scale_ref, shift_ref, o_ref):
    y = y_ref[...].astype(jnp.float32)
    o_ref[...] = jnp.maximum(y * scale_ref[...] + shift_ref[...], 0.0).astype(o_ref.dtype)


def _bn_sc_matmul_relu_kernel(y_ref, scale_ref, shift_ref, xsc_ref, wsc_ref, o_ref):
    # fused: relu(bn2(y) + (1x1 shortcut conv)(x))
    res = jnp.dot(xsc_ref[0], wsc_ref[...], preferred_element_type=jnp.float32)
    y = y_ref[0].astype(jnp.float32)
    o_ref[0] = jnp.maximum(y * scale_ref[...] + shift_ref[...] + res, 0.0).astype(o_ref.dtype)


def _bn_sc_identity_relu_kernel(y_ref, scale_ref, shift_ref, res_ref, o_ref):
    # fused: relu(bn2(y) + x)
    y = y_ref[...].astype(jnp.float32)
    o_ref[...] = jnp.maximum(
        y * scale_ref[...] + shift_ref[...] + res_ref[...], 0.0).astype(o_ref.dtype)


def _bn_relu_apply(y, scale, shift, row_limit, out_dtype):
    G, tm, cp = y.shape
    tb = _pick_tb(G, tm, row_limit)
    return pl.pallas_call(
        _bn_relu_kernel,
        grid=(G // tb,),
        in_specs=[pl.BlockSpec((tb, tm, cp), lambda i: (i, 0, 0)),
                  pl.BlockSpec((1, cp), lambda i: (0, 0)),
                  pl.BlockSpec((1, cp), lambda i: (0, 0))],
        out_specs=pl.BlockSpec((tb, tm, cp), lambda i: (i, 0, 0)),
        out_shape=jax.ShapeDtypeStruct((G, tm, cp), out_dtype),
        compiler_params=_mosaic_params(1),
    )(y, scale, shift)


def _bn_sc_matmul_relu_apply(y, scale, shift, xsc, wsc):
    G, tm, cp = y.shape
    ck = wsc.shape[0]
    return pl.pallas_call(
        _bn_sc_matmul_relu_kernel,
        grid=(G,),
        in_specs=[pl.BlockSpec((1, tm, cp), lambda i: (i, 0, 0)),
                  pl.BlockSpec((1, cp), lambda i: (0, 0)),
                  pl.BlockSpec((1, cp), lambda i: (0, 0)),
                  pl.BlockSpec((1, tm, ck), lambda i: (i, 0, 0)),
                  pl.BlockSpec((ck, cp), lambda i: (0, 0))],
        out_specs=pl.BlockSpec((1, tm, cp), lambda i: (i, 0, 0)),
        out_shape=jax.ShapeDtypeStruct((G, tm, cp), jnp.float32),
        compiler_params=_mosaic_params(1),
    )(y, scale, shift, xsc, wsc)


def _bn_sc_identity_relu_apply(y, scale, shift, res, row_limit):
    G, tm, cp = y.shape
    tb = _pick_tb(G, tm, row_limit)
    return pl.pallas_call(
        _bn_sc_identity_relu_kernel,
        grid=(G // tb,),
        in_specs=[pl.BlockSpec((tb, tm, cp), lambda i: (i, 0, 0)),
                  pl.BlockSpec((1, cp), lambda i: (0, 0)),
                  pl.BlockSpec((1, cp), lambda i: (0, 0)),
                  pl.BlockSpec((tb, tm, cp), lambda i: (i, 0, 0))],
        out_specs=pl.BlockSpec((tb, tm, cp), lambda i: (i, 0, 0)),
        out_shape=jax.ShapeDtypeStruct((G, tm, cp), jnp.float32),
        compiler_params=_mosaic_params(1),
    )(y, scale, shift, res)


def _bn_scale_shift(sums, sumsqs, count, gamma, beta, cp):
    """Fold batch statistics + affine params into per-channel scale/shift (f32, (1, cp))."""
    mu = sums / count
    var = jnp.maximum(sumsqs / count - mu * mu, 0.0)   # biased variance (PyTorch training BN)
    g = jnp.pad(gamma.astype(jnp.float32), (0, cp - gamma.shape[0]))
    b = jnp.pad(beta.astype(jnp.float32), (0, cp - beta.shape[0]))
    scale = g * lax.rsqrt(var + BN_EPS)
    shift = b - mu * scale
    return scale.reshape(1, cp), shift.reshape(1, cp)


# ------------------------------ BasicBlock forward --------------------------- #

def basic_block_forward(x_nchw, params, stride, *, max_rows=2048, apply_rows=8192):
    """Pallas BasicBlock forward. Input/output are NCHW float32."""
    assert stride in (1, 2), "BasicBlock Pallas kernel supports stride 1 or 2"
    x = jnp.transpose(x_nchw, (0, 2, 3, 1)).astype(jnp.float32)   # NHWC
    N, H, W, c_in = x.shape
    dim = params["w1"].shape[0]
    assert params["w1"].shape[1] == c_in
    Ho = (H - 1) // stride + 1
    Wo = (W - 1) // stride + 1
    M = N * Ho * Wo
    cp = _round_up(dim, _LANE)                                    # padded output channels

    # bf16-first wrapper: all pads / space-to-depth relayouts move half the bytes.
    x_bf = x.astype(jnp.bfloat16)

    # ---------- conv1 (3x3, stride) + BN1 stats ----------
    w1_khwcio = jnp.transpose(params["w1"], (2, 3, 1, 0))         # (3,3,c_in,dim)
    if stride == 1:
        xpad1 = jnp.pad(x_bf, ((0, 0), (1, 1), (1, 1), (0, 0)))
        wk1, cin1, KH1, KW1 = w1_khwcio, c_in, 3, 3
    else:
        assert H % 2 == 0 and W % 2 == 0, "stride-2 path requires even spatial dims"
        # space-to-depth fold: stride-2 3x3 conv -> stride-1 2x2 conv over 4*c_in channels
        xp = jnp.pad(x_bf, ((0, 0), (1, 1), (1, 1), (0, 0)))
        xpad1 = xp.reshape(N, (H + 2) // 2, 2, (W + 2) // 2, 2, c_in)
        xpad1 = jnp.transpose(xpad1, (0, 1, 3, 2, 4, 5)).reshape(
            N, (H + 2) // 2, (W + 2) // 2, 4 * c_in)
        wz = jnp.pad(w1_khwcio, ((0, 1), (0, 1), (0, 0), (0, 0)))         # (4,4,c_in,dim)
        wk1 = jnp.transpose(wz.reshape(2, 2, 2, 2, c_in, dim),
                            (0, 2, 1, 3, 4, 5)).reshape(2, 2, 4 * c_in, dim)
        cin1, KH1, KW1 = 4 * c_in, 2, 2
    cin1_p = _round_up(cin1, _LANE)
    xpad1 = jnp.pad(xpad1, ((0, 0), (0, 0), (0, 0), (0, cin1_p - cin1)))
    w1_mat = _pack_weight(wk1, cin1_p, cp)

    y1, s1, ss1 = _conv_bn_stats(xpad1, w1_mat, KH1, KW1, Ho, Wo, cp, max_rows)
    G, tm, _ = y1.shape
    scale1, shift1 = _bn_scale_shift(s1, ss1, M, params["g1"], params["b1"], cp)
    a1 = _bn_relu_apply(y1, scale1, shift1, apply_rows, jnp.bfloat16)      # (G, tm, cp) bf16

    # ---------- conv2 (3x3, stride 1) + BN2 stats ----------
    # TODO(synk): fuse BN1-apply + zero-pad into conv2's im2col prologue to drop this pad.
    xpad2 = jnp.pad(a1.reshape(N, Ho, Wo, cp), ((0, 0), (1, 1), (1, 1), (0, 0)))
    w2_mat = _pack_weight(jnp.transpose(params["w2"], (2, 3, 1, 0)), cp, cp)
    y2, s2, ss2 = _conv_bn_stats(xpad2, w2_mat, 3, 3, Ho, Wo, cp, max_rows)
    assert y2.shape == (G, tm, cp)
    scale2, shift2 = _bn_scale_shift(s2, ss2, M, params["g2"], params["b2"], cp)

    # ---------- BN2-apply + shortcut + add + ReLU (fused) ----------
    if params["w_sc"] is not None:
        cin_sc_p = _round_up(c_in, _LANE)
        xs = x_bf[:, ::stride, ::stride, :]                                # (N,Ho,Wo,c_in)
        xs = jnp.pad(xs, ((0, 0), (0, 0), (0, 0), (0, cin_sc_p - c_in)))
        xs = xs.reshape(G, tm, cin_sc_p)                                   # bf16, tile-major
        wsc = params["w_sc"].reshape(dim, c_in).T                          # (c_in, dim)
        wsc = jnp.pad(wsc, ((0, cin_sc_p - c_in), (0, cp - dim))).astype(jnp.bfloat16)
        out = _bn_sc_matmul_relu_apply(y2, scale2, shift2, xs, wsc)
    else:
        assert stride == 1 and c_in == dim, \
            "identity shortcut requires stride==1 and in_dim==dim"
        # exact f32 identity residual
        res = jnp.pad(x, ((0, 0), (0, 0), (0, 0), (0, cp - c_in))).reshape(G, tm, cp)
        out = _bn_sc_identity_relu_apply(y2, scale2, shift2, res, apply_rows)

    out = out.reshape(N, Ho, Wo, cp)[:, :, :, :dim]
    return jnp.transpose(out, (0, 3, 1, 2)).astype(x_nchw.dtype)           # NCHW


# ------------------------------ pure-JAX reference ---------------------------- #

def _ref_basic_block(x, p, stride):
    def conv(xx, w, s, pad):
        return lax.conv_general_dilated(
            xx, w, (s, s), [(pad, pad), (pad, pad)],
            dimension_numbers=("NCHW", "OIHW", "NCHW"),
            precision=lax.Precision.HIGHEST)

    def bn(xx, g, b):
        mu = xx.mean(axis=(0, 2, 3), keepdims=True)
        var = ((xx - mu) ** 2).mean(axis=(0, 2, 3), keepdims=True)
        return (xx - mu) / jnp.sqrt(var + BN_EPS) * g.reshape(1, -1, 1, 1) + b.reshape(1, -1, 1, 1)

    out = jax.nn.relu(bn(conv(x, p["w1"], stride, 1), p["g1"], p["b1"]))
    out = bn(conv(out, p["w2"], 1, 1), p["g2"], p["b2"])
    sc = x if p["w_sc"] is None else conv(x, p["w_sc"], stride, 0)
    return jax.nn.relu(out + sc)


# ------------------------------------ main ------------------------------------ #

if __name__ == "__main__":
    keys = jax.random.split(jax.random.PRNGKey(0), 16)

    # Tolerance note: kernel matmuls use bf16 MXU inputs with f32 accumulation and the conv
    # outputs are stored as bf16 (BN stats stay exact), compared against a full-f32 reference.
    ATOL = RTOL = 5e-2

    # --- Config A: projection shortcut (in_dim != dim), stride 2 (folded conv path) ---
    in_dim, dim, stride = 4, 8, 2
    N, H, W = 2, 16, 16
    x = jax.random.normal(keys[0], (N, in_dim, H, W), jnp.float32)
    params = {
        "w1": jax.random.normal(keys[1], (dim, in_dim, 3, 3), jnp.float32) / math.sqrt(in_dim * 9),
        "w2": jax.random.normal(keys[2], (dim, dim, 3, 3), jnp.float32) / math.sqrt(dim * 9),
        "w_sc": jax.random.normal(keys[3], (dim, in_dim, 1, 1), jnp.float32) / math.sqrt(in_dim),
        "g1": 1.0 + 0.2 * jax.random.normal(keys[4], (dim,), jnp.float32),
        "b1": 0.1 * jax.random.normal(keys[5], (dim,), jnp.float32),
        "g2": 1.0 + 0.2 * jax.random.normal(keys[6], (dim,), jnp.float32),
        "b2": 0.1 * jax.random.normal(keys[7], (dim,), jnp.float32),
    }
    out = jax.block_until_ready(basic_block_forward(x, params, stride))
    ref = jax.block_until_ready(_ref_basic_block(x, params, stride))
    assert out.shape == ref.shape == (N, dim, H // stride, W // stride)
    err = float(jnp.max(jnp.abs(out - ref)))
    assert jnp.allclose(out, ref, atol=ATOL, rtol=RTOL), f"config A max abs diff = {err}"

    # --- Config B: identity shortcut (in_dim == dim), stride 1; small tiles so the
    #     multi-tile (T > 1, tb > 1) grid paths and the identity-residual kernel run ---
    in_dim2 = dim2 = 8
    x2 = jax.random.normal(keys[8], (N, in_dim2, H, W), jnp.float32)
    params2 = {
        "w1": jax.random.normal(keys[9], (dim2, in_dim2, 3, 3), jnp.float32) / math.sqrt(in_dim2 * 9),
        "w2": jax.random.normal(keys[10], (dim2, dim2, 3, 3), jnp.float32) / math.sqrt(dim2 * 9),
        "w_sc": None,
        "g1": 1.0 + 0.2 * jax.random.normal(keys[11], (dim2,), jnp.float32),
        "b1": 0.1 * jax.random.normal(keys[12], (dim2,), jnp.float32),
        "g2": 1.0 + 0.2 * jax.random.normal(keys[13], (dim2,), jnp.float32),
        "b2": 0.1 * jax.random.normal(keys[14], (dim2,), jnp.float32),
    }
    out2 = jax.block_until_ready(basic_block_forward(x2, params2, 1, max_rows=32, apply_rows=64))
    ref2 = jax.block_until_ready(_ref_basic_block(x2, params2, 1))
    assert out2.shape == ref2.shape == (N, dim2, H, W)
    err2 = float(jnp.max(jnp.abs(out2 - ref2)))
    assert jnp.allclose(out2, ref2, atol=ATOL, rtol=RTOL), f"config B max abs diff = {err2}"

    print("KERNEL_OK")
</pallas_src>

<mosaic_0001>
module attributes {stable_mosaic.version = 11 : i64} {
  func.func @kernel(%arg0: i32, %arg1: i32, %arg2: memref<1x9x9x128xbf16, #tpu.memory_space<vmem>>, %arg3: memref<512x128xbf16, #tpu.memory_space<vmem>>, %arg4: memref<1x64x128xbf16, #tpu.memory_space<vmem>>, %arg5: memref<1x2x128xf32, #tpu.memory_space<vmem>>, %arg6: memref<64x512xbf16, #tpu.memory_space<vmem>>) attributes {dimension_semantics = [#tpu.dimension_semantics<parallel>, #tpu.dimension_semantics<parallel>], iteration_bounds = array<i64: 2, 1>, scalar_prefetch = 0 : i64, scratch_operands = 1 : i64, tpu.core_type = #tpu.core_type<tc>, window_params = [{transform_indices = @transform_0, window_bounds = array<i64: 1, 9, 9, 128>}, {pipeline_mode = #tpu.pipeline_mode<synchronous>, transform_indices = @transform_1, window_bounds = array<i64: 512, 128>}, {transform_indices = @transform_2, window_bounds = array<i64: 1, 64, 128>}, {transform_indices = @transform_3, window_bounds = array<i64: 1, 2, 128>}]} {
    %c8_i32 = arith.constant 8 : i32
    %0 = arith.muli %arg1, %c8_i32 : i32
    %1 = tpu.assume_multiple %0, 8 : i32
    %c0_i32 = arith.constant 0 : i32
    %2 = arith.addi %1, %c0_i32 : i32
    %c0 = arith.constant 0 : index
    %3 = arith.index_cast %2 : i32 to index
    %c0_0 = arith.constant 0 : index
    %c0_1 = arith.constant 0 : index
    %4 = vector.load %arg2[%c0, %3, %c0_0, %c0_1] : memref<1x9x9x128xbf16, #tpu.memory_space<vmem>>, vector<1x8x9x128xbf16>
    %5 = vector.shape_cast %4 : vector<1x8x9x128xbf16> to vector<8x9x128xbf16>
    %6 = vector.extract_strided_slice %5 {offsets = [0, 0, 0], sizes = [8, 8, 128], strides = [1, 1, 1]} : vector<8x9x128xbf16> to vector<8x8x128xbf16>
    %7 = vector.shape_cast %6 : vector<8x8x128xbf16> to vector<64x128xbf16>
    %c0_2 = arith.constant 0 : index
    %c0_3 = arith.constant 0 : index
    %8 = vector.load %arg6[%c0_2, %c0_3] : memref<64x512xbf16, #tpu.memory_space<vmem>>, vector<64x128xbf16>
    tpu.vector_store %arg6[%c0_2, %c0_3], %7 {strides = array<i32>} : memref<64x512xbf16, #tpu.memory_space<vmem>>, vector<64x128xbf16>,
    %9 = vector.extract_strided_slice %5 {offsets = [0, 1, 0], sizes = [8, 8, 128], strides = [1, 1, 1]} : vector<8x9x128xbf16> to vector<8x8x128xbf16>
    %10 = vector.shape_cast %9 : vector<8x8x128xbf16> to vector<64x128xbf16>
    %c0_4 = arith.constant 0 : index
    %c128 = arith.constant 128 : index
    %11 = vector.load %arg6[%c0_4, %c128] : memref<64x512xbf16, #tpu.memory_space<vmem>>, vector<64x128xbf16>
    tpu.vector_store %arg6[%c0_4, %c128], %10 {strides = array<i32>} : memref<64x512xbf16, #tpu.memory_space<vmem>>, vector<64x128xbf16>,
    %c1_i32 = arith.constant 1 : i32
    %12 = arith.addi %1, %c1_i32 : i32
    %c0_5 = arith.constant 0 : index
    %13 = arith.index_cast %12 : i32 to index
    %c0_6 = arith.constant 0 : index
    %c0_7 = arith.constant 0 : index
    %14 = vector.load %arg2[%c0_5, %13, %c0_6, %c0_7] : memref<1x9x9x128xbf16, #tpu.memory_space<vmem>>, vector<1x8x9x128xbf16>
    %15 = vector.shape_cast %14 : vector<1x8x9x128xbf16> to vector<8x9x128xbf16>
    %16 = vector.extract_strided_slice %15 {offsets = [0, 0, 0], sizes = [8, 8, 128], strides = [1, 1, 1]} : vector<8x9x128xbf16> to vector<8x8x128xbf16>
    %17 = vector.shape_cast %16 : vector<8x8x128xbf16> to vector<64x128xbf16>
    %c0_8 = arith.constant 0 : index
    %c256 = arith.constant 256 : index
    %18 = vector.load %arg6[%c0_8, %c256] : memref<64x512xbf16, #tpu.memory_space<vmem>>, vector<64x128xbf16>
    tpu.vector_store %arg6[%c0_8, %c256], %17 {strides = array<i32>} : memref<64x512xbf16, #tpu.memory_space<vmem>>, vector<64x128xbf16>,
    %19 = vector.extract_strided_slice %15 {offsets = [0, 1, 0], sizes = [8, 8, 128], strides = [1, 1, 1]} : vector<8x9x128xbf16> to vector<8x8x128xbf16>
    %20 = vector.shape_cast %19 : vector<8x8x128xbf16> to vector<64x128xbf16>
    %c0_9 = arith.constant 0 : index
    %c384 = arith.constant 384 : index
    %21 = vector.load %arg6[%c0_9, %c384] : memref<64x512xbf16, #tpu.memory_space<vmem>>, vector<64x128xbf16>
    tpu.vector_store %arg6[%c0_9, %c384], %20 {strides = array<i32>} : memref<64x512xbf16, #tpu.memory_space<vmem>>, vector<64x128xbf16>,
    %c0_10 = arith.constant 0 : index
    %c0_11 = arith.constant 0 : index
    %22 = vector.load %arg6[%c0_10, %c0_11] : memref<64x512xbf16, #tpu.memory_space<vmem>>, vector<64x512xbf16>
    %c0_12 = arith.constant 0 : index
    %c0_13 = arith.constant 0 : index
    %23 = vector.load %arg3[%c0_12, %c0_13] : memref<512x128xbf16, #tpu.memory_space<vmem>>, vector<512x128xbf16>
    %cst = arith.constant dense<0.000000e+00> : vector<64x128xf32>
    %24 = tpu.matmul %22, %23, %cst {dimension_numbers = #tpu.dot_dimension_numbers<[1], [0], [0], [1], [0, 0, 1, 1], [], []>} : vector<64x512xbf16>, vector<512x128xbf16>, vector<64x128xf32> -> vector<64x128xf32>
    %25 = vector.shape_cast %24 : vector<64x128xf32> to vector<1x64x128xf32>
    %26 = arith.truncf %25 : vector<1x64x128xf32> to vector<1x64x128xbf16>
    %c0_14 = arith.constant 0 : index
    %c0_15 = arith.constant 0 : index
    %c0_16 = arith.constant 0 : index
    %27 = vector.load %arg4[%c0_14, %c0_15, %c0_16] : memref<1x64x128xbf16, #tpu.memory_space<vmem>>, vector<1x64x128xbf16>
    tpu.vector_store %arg4[%c0_14, %c0_15, %c0_16], %26 {strides = array<i32>} : memref<1x64x128xbf16, #tpu.memory_space<vmem>>, vector<1x64x128xbf16>,
    %cst_17 = arith.constant dense<0.000000e+00> : vector<128xf32>
    %28 = vector.multi_reduction <add>, %24, %cst_17 [0] : vector<64x128xf32> to vector<128xf32>
    %29 = vector.shape_cast %28 : vector<128xf32> to vector<1x128xf32>
    %30 = arith.mulf %24, %24 : vector<64x128xf32>
    %cst_18 = arith.constant dense<0.000000e+00> : vector<128xf32>
    %31 = vector.multi_reduction <add>, %30, %cst_18 [0] : vector<64x128xf32> to vector<128xf32>
    %32 = vector.shape_cast %31 : vector<128xf32> to vector<1x128xf32>
    %33 = tpu.concatenate %29, %32 in 0 : vector<1x128xf32>, vector<1x128xf32> -> vector<2x128xf32>
    %34 = vector.shape_cast %33 : vector<2x128xf32> to vector<1x2x128xf32>
    %c0_19 = arith.constant 0 : index
    %c0_20 = arith.constant 0 : index
    %c0_21 = arith.constant 0 : index
    %35 = vector.load %arg5[%c0_19, %c0_20, %c0_21] : memref<1x2x128xf32, #tpu.memory_space<vmem>>, vector<1x2x128xf32>
    tpu.vector_store %arg5[%c0_19, %c0_20, %c0_21], %34 {strides = array<i32>} : memref<1x2x128xf32, #tpu.memory_space<vmem>>, vector<1x2x128xf32>,
    return
  }
  func.func @transform_0(%arg0: i32, %arg1: i32) -> (i32, i32, i32, i32) {
    %c0_i32 = arith.constant 0 : i32
    %c0_i32_0 = arith.constant 0 : i32
    %c0_i32_1 = arith.constant 0 : i32
    %c0_i32_2 = arith.constant 0 : i32
    return %arg0, %c0_i32, %c0_i32_0, %c0_i32_1 : i32, i32, i32, i32
  }
  func.func @transform_1(%arg0: i32, %arg1: i32) -> (i32, i32) {
    %c0_i32 = arith.constant 0 : i32
    %c0_i32_0 = arith.constant 0 : i32
    %c0_i32_1 = arith.constant 0 : i32
    return %c0_i32, %c0_i32_0 : i32, i32
  }
  func.func @transform_2(%arg0: i32, %arg1: i32) -> (i32, i32, i32) {
    %c1_i32 = arith.constant 1 : i32
    %0 = arith.muli %arg0, %c1_i32 : i32
    %1 = arith.addi %0, %arg1 : i32
    %c0_i32 = arith.constant 0 : i32
    %c0_i32_0 = arith.constant 0 : i32
    %c0_i32_1 = arith.constant 0 : i32
    return %1, %c0_i32, %c0_i32_0 : i32, i32, i32
  }
  func.func @transform_3(%arg0: i32, %arg1: i32) -> (i32, i32, i32) {
    %c1_i32 = arith.constant 1 : i32
    %0 = arith.muli %arg0, %c1_i32 : i32
    %1 = arith.addi %0, %arg1 : i32
    %c0_i32 = arith.constant 0 : i32
    %c0_i32_0 = arith.constant 0 : i32
    %c0_i32_1 = arith.constant 0 : i32
    return %1, %c0_i32, %c0_i32_0 : i32, i32, i32
  }
}

</mosaic_0001>

<bundles_post_ra>
// kernel: tpu_custom_call.1
= control target key start
LH: loop header
LB: loop body
LE: loop exit
PB: predicated region body
PF: predicated region fallthrough
CT: control target
= control target key end

     0   :  { %9 = vsyncpa [#allocation4], 0  ;;  %s2036_s0 = inlined_call_operand.vmem [shape: bf16[2,9,9,128], index: 0, kind: input, shape index: {}]   ;;  %s2037_s1 = inlined_call_operand.hbm [shape: bf16[512,128], index: 1, kind: input, shape index: {}]   ;;  %s2038_s2 = inlined_call_operand.hbm [shape: bf16[2,64,128], index: 2, kind: output, shape index: {0}]   ;;  %s2039_s3 = inlined_call_operand.hbm [shape: f32[2,2,128], index: 3, kind: output, shape index: {1}]  }
   0x1   :  { %10 = vsyncpa [#allocation5], 0 }
   0x2   :  { %12 = vsyncpa [#allocation5 + $0x1], 0 }
   0x3   :  { %13 = vsyncpa [#allocation8], 0 }
   0x4   :  { %15 = vsyncpa [#allocation8 + $0x1], 0  ;;  %s1700_s12 = smov 0   ;;  %s1702_s13 = smov 0  }
   0x5   :  { %s1704_s14 = smov 0   ;;  %s1706_s15 = smov 0  }
   0x6   :  { %s1708_s16 = smov 0   ;;  %s1710_s17 = smov 0  }
   0x7 LB: > { %s1212_s18 = sadd.s32 4294967295, %s1671_s17   ;;  %s1213_s19 = sadd.s32 4294967294, %s1671_s17   ;;  %s1671_s17 = sphi %s1710_s17, %s21_s17   ;;  %s1667_s16 = sphi %s1708_s16, %s2059_s16   ;;  %s1663_s15 = sphi %s1706_s15, %s2058_s15   ;;  %s1659_s14 = sphi %s1704_s14, %s2057_s14   ;;  %s1655_s13 = sphi %s1702_s13, %s2056_s13   ;;  %s1651_s12 = sphi %s1700_s12, %s2055_s12  }
   0x8   : > { %s33_s20 = sadd.s32 1, %s1667_s16  ;;  %s89_s21 = sadd.s32 1, %s1659_s14 }
   0x9   : > { %p35_p0 = scmp.ge.s32.totalorder %s33_s20, 2  ;;  %p99_p1 = scmp.ne.s32.totalorder %s1659_s14, %s1655_s13 }
   0xa   : > { %p100_p2 = scmp.eq.s32.totalorder %s1212_s18, 1  ;;  %p105_p3 = scmp.ne.s32.totalorder %s1655_s13, %s1651_s12 }
   0xb   : > { %s2061_s20 = smov (%p35_p0, %s33_s20), 0  ;;  %p106_p5 = scmp.eq.s32.totalorder %s1213_s19, 1 }
   0xc   : > { %p1740_p4 = por %p100_p2, %p99_p1  ;;  %s86_s23 = ssub.s32 %s1667_s16, %s2061_s20 }
   0xd   : > { %p1214_p6 = scmp.ge.s32.totalorder %s1671_s17, 1  ;;  %p87_p7 = scmp.eq.s32.totalorder %s86_s23, 0 }
   0xe   : > { %s2044_s22 = scalar_select %p1740_p4, 1, 0 }
   0xf   : > { %p1747_p8 = por %p106_p5, %p105_p3  ;;  %p141_p9 = scmp.lt.s32.totalorder %s1671_s17, 3 }
  0x10   : > { %s1753_s25 = scalar_select %p87_p7, %s1659_s14, %s89_s21  }
  0x11   : > { %s2045_s24 = scalar_select %p1747_p8, 1, 0 }
  0x12   : > { %p1755_p10 = pnand %p1214_p6, %p141_p9  ;;  %p1759_p11 = scmp.eq.s32.totalorder %s1212_s18, 0 }
  0x13   : > { %s1673_s28 = smov [#allocation3]   ;;  %s1529_s6 = scalar_lea.hbm %s2037_s1, 4096 }
  0x14   : > { %s2046_s26 = scalar_select %p1755_p10, 1, 0 }
  0x15   : > { %s2047_s27 = scalar_select %p1759_p11, 1, 0 }
  0x16   : > { %p1422_p12 = pneg %p1755_p10  ;;  %s153_s29 = sshll.u32 %s1673_s28, 4  ;;  %s154_s29 = int_to_ptr.vmem [resolvable:$true] %s153_s29 }
  0x17   : > { %p1530_p0 = scmp.ne.s32.totalorder %s2037_s1, %s1529_s6  ;;  %p1536_p5 = scmp.lt.u32.totalorder %s1529_s6, %s2037_s1 }
  0x18   : > { %p1767_p13 = pnand %p1759_p11, %p1422_p12 }
  0x1a   : > { %p1531_p1 = pneg %p1767_p13 }
  0x1c   : > { %p1532_p2 = pnand %p1531_p1, %p1530_p0 }
  0x1e   : > { %p1533_p3 = pneg %p1532_p2 }
  0x20   : > { %p1538_p6 = pnand %p1536_p5, %p1533_p3 }
  0x22   : > { %1541 = shalt.err (!%p1538_p6)
}
  0x23   : > { %s1542_s11 = scalar_lea.vmem %s154_s29, 4096  ;;  %p1550_p8 = scmp.lt.s32.totalorder %s154_s29, %s154_s29 }
  0x24   : > { %p1543_p7 = scmp.ne.s32.totalorder %s154_s29, %s1542_s11  ;;  %p1551_p4 = scmp.lt.s32.totalorder %s1542_s11, %s1542_s11 }
  0x26   : > { %p1545_p9 = pnand %p1543_p7, %p1531_p1  ;;  %p1552_p11 = por %p1551_p4, %p1550_p8 }
  0x28   : > { %p1546_p12 = pneg %p1545_p9 }
  0x2a   : > { %p1553_p10 = pnand %p1552_p11, %p1546_p12 }
  0x2c   : > { %1556 = shalt.err (!%p1553_p10)
}
  0x2d   : > { %s1674_s18 = smov 64   ;;  %s1675_s19 = smov 4  }
  0x2e   : > { %1425 = dma.hbm_to_vmem [thread:$0]  (!%p1767_p13), %s2037_s1, 4096, %s154_s29, [#allocation4], %s1674_s18, %s1674_s18, %s1675_s19  }
  0x2f   : > { %p2049_p0 = scmp.ne.s32.totalorder %s2046_s26, 0 }
  0x30   : > { %p2050_p2 = scmp.ne.s32.totalorder (!%p2049_p0), %s2047_s27, 0 }
  0x31   : > { %177 = sbr.rel (%p2049_p0) target bundleno = 380 (0x17c), region = 28 }
  0x38   : > { %1638 = dma.done.wait (%p2050_p2), [#allocation4], 4096  }
  0x39   : > { %1640 = vsyncadd (%p2050_p2), [#allocation4], 4294963200  ;;  %v1489_v0 = vld [vmem:[#allocation3 + $0x40] sm:$0xff]   ;;  %v1493_v4 = vld [vmem:[#allocation3 + $0x48] sm:$0xff]   ;;  %p206_p4 = scmp.lt.s32.totalorder %s1663_s15, 1  ;;  %s1941_s4 = sand.u32 1, %s1655_s13  }
  0x3a   : > { %v1490_v1 = vld [vmem:[#allocation3 + $0xc0] sm:$0xff]   ;;  %1333 = vmatprep.subr.bf16.mxu0 %v1489_v0  ;;  %v1494_v5 = vld [vmem:[#allocation3 + $0xc8] sm:$0xff]   ;;  %v1497_v8 = vld [vmem:[#allocation3 + $0x50] sm:$0xff]   ;;  %vm262_vm0 = vsmask.f32 3328  ;;  %s1219_s5 = sshll.u32 %s1941_s4, 5 }
  0x3b   : > { %v1491_v2 = vld [vmem:[#allocation3] sm:$0xff]   ;;  %1373 = vmatprep.subr.bf16.mxu1 %v1490_v1  ;;  %v1495_v6 = vld [vmem:[#allocation3 + $0x8] sm:$0xff]   ;;  %v1498_v9 = vld [vmem:[#allocation3 + $0xd0] sm:$0xff]   ;;  %s207_s26 = scalar_select %p206_p4, %s1663_s15, 1  ;;  %vm263_vm1 = vsmask.f32 7440 }
  0x3c   : > { %v1492_v3 = vld [vmem:[#allocation3 + $0x80] sm:$0xff]   ;;  %1334 = vmatpush3.bf16.msra.mxu0 %v1491_v2  ;;  %v1496_v7 = vld [vmem:[#allocation3 + $0x88] sm:$0xff]   ;;  %v1499_v10 = vld [vmem:[#allocation3 + $0x10] sm:$0xff]   ;;  %s1944_s6 = scalar_lea.vmem [#allocation6], %s1219_s5  ;;  %s1309_s8 = sshll.u32 %s1663_s15, 9 }
  0x3d   : > { %1374 = vmatpush3.bf16.msra.mxu1 %v1492_v3  ;;  %1335 = vmatprep.subr.bf16.mxu0 %v1493_v4  ;;  %v1500_v11 = vld [vmem:[#allocation3 + $0x90] sm:$0xff]   ;;  %v1501_v12 = vld [vmem:[#allocation3 + $0x58] sm:$0xff]   ;;  %v1505_v16 = vld [vmem:[#allocation3 + $0x60] sm:$0xff]   ;;  %s1413_s27 = smul.u32 72, %s207_s26  ;;  %s1076_s7 = sshll.u32 %s1944_s6, 4  ;;  %s1951_s7 = int_to_ptr.vmem [resolvable:$true] %s1076_s7 }
  0x3e   : > { %1375 = vmatprep.subr.bf16.mxu1 %v1494_v5  ;;  %v1502_v13 = vld [vmem:[#allocation3 + $0xd8] sm:$0xff]   ;;  %v1506_v17 = vld [vmem:[#allocation3 + $0xe0] sm:$0xff]   ;;  %v1509_v20 = vld [vmem:[#allocation3 + $0x68] sm:$0xff]   ;;  %s1956_s11 = scalar_lea.hbm %s2038_s2, %s1309_s8  ;;  %s1057_s18 = scalar_lea.sflag [#allocation5], %s1941_s4 }
  0x3f   : > { %v1503_v14 = vld [vmem:[#allocation3 + $0x18] sm:$0xff]   ;;  %v1507_v18 = vld [vmem:[#allocation3 + $0x20] sm:$0xff]   ;;  %v1510_v21 = vld [vmem:[#allocation3 + $0xe8] sm:$0xff]   ;;  %s1798_s30 = scalar_lea.vmem %s2036_s0, %s1413_s27  ;;  %s1557_s19 = scalar_lea.vmem %s1951_s7, 512 }
  0x40   : > { %1336 = vmatpush3.bf16.msra.mxu0 %v1495_v6  ;;  %v1504_v15 = vld [vmem:[#allocation3 + $0x98] sm:$0xff]   ;;  %v1508_v19 = vld [vmem:[#allocation3 + $0xa0] sm:$0xff]   ;;  %v1511_v22 = vld [vmem:[#allocation3 + $0x28] sm:$0xff]   ;;  %p1558_p8 = scmp.ne.s32.totalorder %s1951_s7, %s1557_s19  ;;  %p2053_p10 = scmp.ne.s32.totalorder %s2044_s22, 0 }
  0x41   : > { %1376 = vmatpush3.bf16.msra.mxu1 %v1496_v7  ;;  %1337 = vmatprep.subr.bf16.mxu0 %v1497_v8  ;;  %v1512_v23 = vld [vmem:[#allocation3 + $0xa8] sm:$0xff]   ;;  %v1513_v24 = vld [vmem:[#allocation3 + $0x70] sm:$0xff]   ;;  %v1517_v28 = vld [vmem:[#allocation3 + $0x78] sm:$0xff]   ;;  %s1676_s21 = smov [#allocation6]  }
  0x42   : > { %1377 = vmatprep.subr.bf16.mxu1 %v1498_v9  ;;  %v1514_v25 = vld [vmem:[#allocation3 + $0xf0] sm:$0xff]   ;;  %v1518_v29 = vld [vmem:[#allocation3 + $0xf8] sm:$0xff]   ;;  %v1801_v32 = vld [vmem:[%s1798_s30] sm:$0xf]  ;;  %p1559_p11 = pnand %p1558_p8, %p2053_p10  ;;  %s1561_s23 = sshll.u32 %s1676_s21, 4  ;;  %s1562_s23 = int_to_ptr.vmem [resolvable:$false] %s1561_s23 }
  0x43   : > { %v1515_v26 = vld [vmem:[#allocation3 + $0x30] sm:$0xff]   ;;  %v1519_v30 = vld [vmem:[#allocation3 + $0x38] sm:$0xff]   ;;  %v219_v33 = vld [vmem:[%s1798_s30 + $0x4] sm:$0x1]  ;;  %v266_v36 = vshrl.u32 %v1801_v32, 16  ;;  %v269_v37 = vshll.u32 %v1801_v32, 16  ;;  %p1564_p1 = scmp.lt.s32.totalorder %s1951_s7, %s1562_s23 }
  0x44   : > { %1338 = vmatpush3.bf16.msra.mxu0 %v1499_v10  ;;  %v1516_v27 = vld [vmem:[#allocation3 + $0xb0] sm:$0xff]   ;;  %v1520_v31 = vld [vmem:[#allocation3 + $0xb8] sm:$0xff]   ;;  %v1805_v34 = vld [vmem:[%s1798_s30 + $0x8] sm:$0xf]  ;;  %v275_v38 = vshll.u32 %v219_v33, 16  ;;  %p1560_p13 = pneg %p1559_p11  ;;  %s1563_s26 = scalar_lea.vmem %s1562_s23, 1024 }
  0x45   : > { %1378 = vmatpush3.bf16.msra.mxu1 %v1500_v11  ;;  %1339 = vmatprep.subr.bf16.mxu0 %v1501_v12  ;;  %v221_v35 = vld [vmem:[%s1798_s30 + $0xc] sm:$0x1]  ;;  %v280_v39 = vshrl.u32 %v1805_v34, 16  ;;  %v283_v40 = vshll.u32 %v1805_v34, 16  ;;  %v1813_v42 = vld [vmem:[%s1798_s30 + $0x8] sm:$0xf]  ;;  %v1222_v44 = vcombine.low %v1801_v32, %v1805_v34  ;;  %vm1831_vm2 = vmor %vm262_vm0, %vm263_vm1  ;;  %p1565_p3 = scmp.lt.s32.totalorder %s1563_s26, %s1557_s19 }
  0x46   : > { %1379 = vmatprep.subr.bf16.mxu1 %v1502_v13  ;;  %v289_v41 = vshll.u32 %v221_v35, 16  ;;  %v1231_v43 = vld [vmem:[%s1798_s30 + $0xc] sm:$0x1]  ;;  %v268_v45 = vrot.slane %v266_v36, 4  ;;  %v271_v46 = vrot.slane %v269_v37, 5  ;;  %v277_v47 = vrot.slane %v275_v38, 5 }
  0x47   : > { %v282_v48 = vrot.slane %v280_v39, 4  ;;  %v1819_v49 = vld [vmem:[%s1798_s30 + $0x10] sm:$0xf]  ;;  %v285_v50 = vrot.slane %v283_v40, 5  ;;  %v1233_v52 = vld [vmem:[%s1798_s30 + $0x14] sm:$0x1]  ;;  %p1566_p5 = por %p1565_p3, %p1564_p1 }
  0x48   : > { %1340 = vmatpush3.bf16.msra.mxu0 %v1503_v14  ;;  %v291_v51 = vrot.slane %v289_v41, 5  ;;  %v446_v53 = vshrl.u32 %v1813_v42, 16  ;;  %v449_v54 = vshll.u32 %v1813_v42, 16  ;;  %v272_v55 = vor.u32 %v271_v46, %v268_v45  ;;  %v1827_v59 = vld [vmem:[%s1798_s30 + $0x10] sm:$0xf] }
  0x49   : > { %1380 = vmatpush3.bf16.msra.mxu1 %v1504_v15  ;;  %1341 = vmatprep.subr.bf16.mxu0 %v1505_v16  ;;  %v455_v56 = vshll.u32 %v1231_v43, 16  ;;  %v460_v57 = vshrl.u32 %v1819_v49, 16  ;;  %v463_v58 = vshll.u32 %v1819_v49, 16  ;;  %v286_v61 = vor.u32 %v285_v50, %v282_v48  ;;  %v223_v1 = vld [vmem:[%s1798_s30 + $0x14] sm:$0x1]  ;;  %p1567_p6 = pnand %p1566_p5, %p1560_p13 }
  0x4a   : > { %1381 = vmatprep.subr.bf16.mxu1 %v1506_v17  ;;  %v448_v62 = vrot.slane %v446_v53, 4  ;;  %v451_v63 = vrot.slane %v449_v54, 5  ;;  %v469_v0 = vshll.u32 %v1233_v52, 16  ;;  %v273_v2 = vrot.slane %v272_v55, 4  ;;  %v1837_v6 = vld [vmem:[%s1798_s30 + $0x18] sm:$0xf] }
  0x4b   : > { %v457_v3 = vrot.slane %v455_v56, 5  ;;  %v462_v4 = vrot.slane %v460_v57, 4  ;;  %v465_v5 = vrot.slane %v463_v58, 5  ;;  %v287_v7 = vrot.slane %v286_v61, 4  ;;  %v225_v13 = vld [vmem:[%s1798_s30 + $0x1c] sm:$0x1] }
  0x4c   : > { %1342 = vmatpush3.bf16.msra.mxu0 %v1507_v18  ;;  %v452_v8 = vor.u32 %v451_v63, %v448_v62  ;;  %v471_v9 = vrot.slane %v469_v0, 5  ;;  %v1246_v10 = vcombine.low %v1813_v42, %v1819_v49  ;;  %v278_v11 = vsel %vm1831_vm2, %v273_v2, %v277_v47  ;;  %v1237_v37 = vld [vmem:[%s1798_s30 + $0x24] sm:$0x1]  ;;  %v1866_v45 = vld [vmem:[%s1798_s30 + $0x20] sm:$0xf] }
  0x4d   : > { %1382 = vmatpush3.bf16.msra.mxu1 %v1508_v19  ;;  %1343 = vmatprep.subr.bf16.mxu0 %v1509_v20  ;;  %v466_v12 = vor.u32 %v465_v5, %v462_v4  ;;  %v294_v14 = vshrl.u32 %v1827_v59, 16  ;;  %v297_v15 = vshll.u32 %v1827_v59, 16  ;;  %v292_v16 = vsel %vm1831_vm2, %v287_v7, %v291_v51  ;;  %v1850_v20 = vld [vmem:[%s1798_s30 + $0x18] sm:$0xf]  ;;  %v227_v49 = vld [vmem:[%s1798_s30 + $0x24] sm:$0x1] }
  0x4e   : > { %1383 = vmatprep.subr.bf16.mxu1 %v1510_v21  ;;  %v453_v17 = vrot.slane %v452_v8, 4  ;;  %v303_v18 = vshll.u32 %v223_v1, 16  ;;  %v308_v19 = vshrl.u32 %v1837_v6, 16  ;;  %v1226_v21 = vcombine.low %v278_v11, %v292_v16  ;;  %v1875_v54 = vld [vmem:[%s1798_s30 + $0x28] sm:$0xf] }
  0x4f   : > { %v317_v33 = vshll.u32 %v225_v13, 16  ;;  %v474_v34 = vshrl.u32 %v1850_v20, 16  ;;  %v477_v38 = vshll.u32 %v1850_v20, 16  ;;  %v497_v52 = vshll.u32 %v1237_v37, 16  ;;  %v229_v62 = vld [vmem:[%s1798_s30 + $0x2c] sm:$0x1] }
  0x50   : > { %1344 = vmatpush3.bf16.msra.mxu0 %v1511_v22  ;;  %v467_v22 = vrot.slane %v466_v12, 4  ;;  %881 = vmatprep.mubr.bf16.mxu0 %v1226_v21  ;;  %v1223_v53 = vcombine.low %v1827_v59, %v1837_v6  ;;  %v322_v63 = vshrl.u32 %v1866_v45, 16  ;;  %v325_v0 = vshll.u32 %v1866_v45, 16  ;;  %v1886_v5 = vld [vmem:[%s1798_s30 + $0x28] sm:$0xf] }
  0x51   : > { %1384 = vmatpush3.bf16.msra.mxu1 %v1512_v23  ;;  %1345 = vmatprep.subr.bf16.mxu0 %v1513_v24  ;;  %v296_v23 = vrot.slane %v294_v14, 4  ;;  %v299_v24 = vrot.slane %v297_v15, 5  ;;  %v319_v41 = vrot.slane %v317_v33, 5  ;;  %v476_v42 = vrot.slane %v474_v34, 4  ;;  %v1890_v11 = vld [vmem:[%s1798_s30 + $0x30] sm:$0xf] }
  0x52   : > { %1385 = vmatprep.subr.bf16.mxu1 %v1514_v25  ;;  %v1235_v25 = vld [vmem:[%s1798_s30 + $0x1c] sm:$0x1]  ;;  %v479_v47 = vrot.slane %v477_v38, 5  ;;  %v499_v61 = vrot.slane %v497_v52, 5  ;;  %v331_v1 = vshll.u32 %v227_v49, 16  ;;  %v336_v4 = vshrl.u32 %v1875_v54, 16 }
  0x53   : > { %v300_v32 = vor.u32 %v299_v24, %v296_v23  ;;  %v483_v39 = vshll.u32 %v1235_v25, 16  ;;  %v324_v8 = vrot.slane %v322_v63, 4  ;;  %v339_v15 = vshll.u32 %v1875_v54, 16  ;;  %v231_v33 = vld [vmem:[%s1798_s30 + $0x34] sm:$0x1] }
  0x54   : > { %1346 = vmatpush3.bf16.msra.mxu0 %v1515_v26  ;;  %v458_v26 = vsel %vm1831_vm2, %v453_v17, %v457_v3  ;;  %v480_v56 = vor.u32 %v479_v47, %v476_v42  ;;  %v338_v14 = vrot.slane %v336_v4, 4  ;;  %v345_v17 = vshll.u32 %v229_v62, 16  ;;  %v1909_v38 = vld [vmem:[%s1798_s30 + $0x38] sm:$0xf]  ;;  %v233_v47 = vld [vmem:[%s1798_s30 + $0x3c] sm:$0x1] }
  0x55   : > { %1386 = vmatpush3.bf16.msra.mxu1 %v1516_v27  ;;  %1347 = vmatprep.subr.bf16.mxu0 %v1517_v28  ;;  %v305_v27 = vrot.slane %v303_v18, 5  ;;  %v310_v28 = vrot.slane %v308_v19, 4  ;;  %v301_v40 = vrot.slane %v300_v32, 4  ;;  %v485_v48 = vrot.slane %v483_v39, 5 }
  0x56   : > { %1387 = vmatprep.subr.bf16.mxu1 %v1518_v29  ;;  %v311_v29 = vshll.u32 %v1837_v6, 16  ;;  %v481_v2 = vrot.slane %v480_v56, 4  ;;  %v1239_v6 = vld [vmem:[%s1798_s30 + $0x2c] sm:$0x1]  ;;  %v502_v18 = vshrl.u32 %v1886_v5, 16  ;;  %v505_v19 = vshll.u32 %v1886_v5, 16 }
  0x57   : > { %v306_v50 = vsel %vm1831_vm2, %v301_v40, %v305_v27  ;;  %v341_v21 = vrot.slane %v339_v15, 5  ;;  %v511_v23 = vshll.u32 %v1239_v6, 16  ;;  %v516_v24 = vshrl.u32 %v1890_v11, 16  ;;  %v1245_v6 = vld [vmem:[%s1798_s30 + $0x44] sm:$0x1] }
  0x58   : > { %1348 = vmatpush3.bf16.msra.mxu0 %v1519_v30  ;;  %v1857_v30 = vld [vmem:[%s1798_s30 + $0x20] sm:$0xf]  ;;  %v313_v36 = vrot.slane %v311_v29, 5  ;;  %v486_v12 = vsel %vm1831_vm2, %v481_v2, %v485_v48  ;;  %v504_v27 = vrot.slane %v502_v18, 4  ;;  %v364_v52 = vshrl.u32 %v1909_v38, 16 }
  0x59   : > { %1388 = vmatpush3.bf16.msra.mxu1 %v1520_v31  ;;  %v472_v31 = vsel %vm1831_vm2, %v467_v22, %v471_v9  ;;  %v488_v43 = vshrl.u32 %v1857_v30, 16  ;;  %v1247_v58 = vcombine.low %v1850_v20, %v1857_v30  ;;  %v327_v9 = vrot.slane %v325_v0, 5  ;;  %v1241_v22 = vld [vmem:[%s1798_s30 + $0x34] sm:$0x1] }
  0x5a   : > { %v1250_v35 = vcombine.low %v458_v26, %v472_v31  ;;  %v314_v46 = vor.u32 %v313_v36, %v310_v28  ;;  %v1902_v28 = vld [vmem:[%s1798_s30 + $0x30] sm:$0xf]  ;;  %v342_v29 = vor.u32 %v341_v21, %v338_v14  ;;  %v507_v31 = vrot.slane %v505_v19, 5 }
  0x5b   : > { %882 = vmatmul.mubr.bf16.vlgmr.msra.gmra.mrb[0].mxu0 %v1222_v44  ;;  %v491_v44 = vshll.u32 %v1857_v30, 16  ;;  %v490_v51 = vrot.slane %v488_v43, 4  ;;  %v328_v16 = vor.u32 %v327_v9, %v324_v8  ;;  %v347_v30 = vrot.slane %v345_v17, 5 }
  0x5c   : > { %946 = vmatprep.mubr.bf16.mxu1 %v1250_v35  ;;  %v315_v55 = vrot.slane %v314_v46, 4  ;;  %v513_v32 = vrot.slane %v511_v23, 5  ;;  %v518_v35 = vrot.slane %v516_v24, 4  ;;  %v519_v36 = vshll.u32 %v1890_v11, 16 }
  0x5d   : > { %947 = vmatmul.mubr.bf16.vlgmr.msra.gmra.mrb[0].mxu1 %v1246_v10  ;;  %v493_v57 = vrot.slane %v491_v44, 5  ;;  %v333_v10 = vrot.slane %v331_v1, 5  ;;  %v329_v26 = vrot.slane %v328_v16, 4  ;;  %v525_v37 = vshll.u32 %v1241_v22, 16 }
  0x5e   : > { %v320_v59 = vsel %vm1831_vm2, %v315_v55, %v319_v41  ;;  %v343_v39 = vrot.slane %v342_v29, 4  ;;  %v508_v40 = vor.u32 %v507_v31, %v504_v27  ;;  %v1224_v41 = vcombine.low %v1866_v45, %v1875_v54  ;;  %v1242_v45 = vld [vmem:[%s1798_s30 + $0x38] sm:$0xf] }
  0x5f   : > { %v494_v3 = vor.u32 %v493_v57, %v490_v51  ;;  %v1227_v7 = vcombine.low %v306_v50, %v320_v59  ;;  %v334_v34 = vsel %vm1831_vm2, %v329_v26, %v333_v10  ;;  %v350_v42 = vshrl.u32 %v1902_v28, 16  ;;  %v1243_v57 = vld [vmem:[%s1798_s30 + $0x3c] sm:$0x1] }
  0x60   : > { %v521_v43 = vrot.slane %v519_v36, 5  ;;  %v1248_v46 = vcombine.low %v1886_v5, %v1890_v11  ;;  %v353_v48 = vshll.u32 %v1902_v28, 16  ;;  %v359_v44 = vshll.u32 %v231_v33, 16 }
  0x61   : > { %v495_v13 = vrot.slane %v494_v3, 4  ;;  %889 = vmatprep.mubr.bf16.mxu0 %v1227_v7  ;;  %v348_v49 = vsel %vm1831_vm2, %v343_v39, %v347_v30  ;;  %v509_v50 = vrot.slane %v508_v40, 4  ;;  %v352_v51 = vrot.slane %v350_v42, 4 }
  0x62   : > { %v522_v54 = vor.u32 %v521_v43, %v518_v35  ;;  %v527_v55 = vrot.slane %v525_v37, 5  ;;  %v355_v56 = vrot.slane %v353_v48, 5  ;;  %v366_v62 = vrot.slane %v364_v52, 4 }
  0x63   : > { %v500_v20 = vsel %vm1831_vm2, %v495_v13, %v499_v61  ;;  %890 = vmatmul.mubr.bf16.gmra.mrb[4].mxu0 %v1223_v53  ;;  %v1228_v53 = vcombine.low %v334_v34, %v348_v49  ;;  %v514_v61 = vsel %vm1831_vm2, %v509_v50, %v513_v32  ;;  %v367_v63 = vshll.u32 %v1909_v38, 16 }
  0x64   : > { %v1251_v25 = vcombine.low %v486_v12, %v500_v20  ;;  %v373_v0 = vshll.u32 %v233_v47, 16  ;;  %v523_v1 = vrot.slane %v522_v54, 4  ;;  %v356_v59 = vor.u32 %v355_v56, %v352_v51 }
  0x65   : > { %897 = vmatprep.mubr.bf16.mxu0 %v1228_v53  ;;  %v530_v2 = vshrl.u32 %v1242_v45, 16  ;;  %v533_v3 = vshll.u32 %v1242_v45, 16  ;;  %v361_v4 = vrot.slane %v359_v44, 5  ;;  %v369_v5 = vrot.slane %v367_v63, 5 }
  0x66   : > { %954 = vmatprep.mubr.bf16.mxu1 %v1251_v25  ;;  %v539_v7 = vshll.u32 %v1243_v57, 16  ;;  %v528_v9 = vsel %vm1831_vm2, %v523_v1, %v527_v55  ;;  %v357_v10 = vrot.slane %v356_v59, 4  ;;  %v375_v15 = vrot.slane %v373_v0, 5 }
  0x67   : > { %955 = vmatmul.mubr.bf16.gmra.mrb[4].mxu1 %v1247_v58  ;;  %v1244_v58 = vld [vmem:[%s1798_s30 + $0x40] sm:$0xf]  ;;  %v532_v11 = vrot.slane %v530_v2, 4  ;;  %v535_v12 = vrot.slane %v533_v3, 5  ;;  %v1252_v13 = vcombine.low %v514_v61, %v528_v9  ;;  %v370_v14 = vor.u32 %v369_v5, %v366_v62 }
  0x68   : > { %v544_v8 = vshrl.u32 %v1244_v58, 16  ;;  %v547_v18 = vshll.u32 %v1244_v58, 16  ;;  %v553_v19 = vshll.u32 %v1245_v6, 16  ;;  %v362_v20 = vsel %vm1831_vm2, %v357_v10, %v361_v4 }
  0x69   : > { %v536_v16 = vor.u32 %v535_v12, %v532_v11  ;;  %962 = vmatprep.mubr.bf16.mxu1 %v1252_v13  ;;  %v371_v21 = vrot.slane %v370_v14, 4  ;;  %v541_v23 = vrot.slane %v539_v7, 5  ;;  %v1225_v26 = vcombine.low %v1902_v28, %v1909_v38 }
  0x6a   : > { %v546_v17 = vrot.slane %v544_v8, 4  ;;  %v549_v24 = vrot.slane %v547_v18, 5  ;;  %v555_v30 = vrot.slane %v553_v19, 5  ;;  %v1249_v34 = vcombine.low %v1242_v45, %v1244_v58 }
  0x6b   : > { %898 = vmatmul.mubr.bf16.gmra.mrb[8].mxu0 %v1224_v41  ;;  %v537_v22 = vrot.slane %v536_v16, 4  ;;  %v376_v25 = vsel %vm1831_vm2, %v371_v21, %v375_v15 }
  0x6c   : > { %v1229_v27 = vcombine.low %v362_v20, %v376_v25  ;;  %v550_v29 = vor.u32 %v549_v24, %v546_v17 }
  0x6d   : > { %v542_v31 = vsel %vm1831_vm2, %v537_v22, %v541_v23 }
  0x6e   : > { %905 = vmatprep.mubr.bf16.mxu0 %v1229_v27  ;;  %v551_v32 = vrot.slane %v550_v29, 4 }
  0x6f   : > { %963 = vmatmul.mubr.bf16.gmra.mrb[8].mxu1 %v1248_v46 }
  0x70   : > { %v556_v33 = vsel %vm1831_vm2, %v551_v32, %v555_v30 }
  0x71   : > { %v1253_v35 = vcombine.low %v542_v31, %v556_v33 }
  0x73   : > { %906 = vmatmul.mubr.bf16.gmra.mrb[12].mxu0 %v1225_v26  ;;  %970 = vmatprep.mubr.bf16.mxu1 %v1253_v35 }
  0x77   : > { %971 = vmatmul.mubr.bf16.gmra.mrb[12].mxu1 %v1249_v34 }
 0x12e   : > { %v1349_v36 = vpop.f32.mrb[0].mxu0 }
 0x12f   : > { %v1350_v37 = vpop.f32.mrb[1].mxu0 }
 0x130   : > { %v1351_v28 = vadd.f32 %v1350_v37, %v1349_v36  ;;  %v1352_v38 = vpop.f32.mrb[2].mxu0  ;;  %v1389_v39 = vpop.f32.mrb[0].mxu1 }
 0x131   : > { %v1353_v40 = vpop.f32.mrb[3].mxu0  ;;  %v1390_v41 = vpop.f32.mrb[1].mxu1 }
 0x132   : > { %v1354_v42 = vadd.f32 %v1353_v40, %v1352_v38  ;;  %v1391_v43 = vadd.f32 %v1390_v41, %v1389_v39  ;;  %v1392_v46 = vpop.f32.mrb[2].mxu1 }
 0x133   : > { %v1393_v47 = vpop.f32.mrb[3].mxu1 }
 0x134   : > { %v949_v60 = vadd.f32 %v1391_v43, %v1351_v28  ;;  %v1394_v48 = vadd.f32 %v1393_v47, %v1392_v46 }
 0x136   : > { %v952_v44 = vadd.f32 %v1394_v48, %v1354_v42  ;;  %v1355_v49 = vpop.f32.mrb[4].mxu0  ;;  %v1032_v50 = vmul.f32 %v949_v60, %v949_v60 }
 0x137   : > { %v1356_v53 = vpop.f32.mrb[5].mxu0 }
 0x138   : > { %v1313_v51 = vpack.c.bf16 %v952_v44, %v949_v60  ;;  %v1019_v52 = vadd.f32 %v952_v44, %v949_v60  ;;  %v1033_v45 = vmul.f32 %v952_v44, %v952_v44  ;;  %v1357_v54 = vadd.f32 %v1356_v53, %v1355_v49  ;;  %v1358_v55 = vpop.f32.mrb[6].mxu0 }
 0x139   : > { %v1359_v57 = vpop.f32.mrb[7].mxu0 }
 0x13a   : > { %1314 = vst [vmem:[%s1944_s6] sm:$0xff] %v1313_v51   ;;  %v1040_v56 = vadd.f32 %v1033_v45, %v1032_v50  ;;  %v1395_v58 = vpop.f32.mrb[4].mxu1  ;;  %v1360_v61 = vadd.f32 %v1359_v57, %v1358_v55 }
 0x13b   : > { %v1396_v62 = vpop.f32.mrb[5].mxu1 }
 0x13c   : > { %v1397_v63 = vadd.f32 %v1396_v62, %v1395_v58  ;;  %v1398_v0 = vpop.f32.mrb[6].mxu1 }
 0x13d   : > { %v1399_v1 = vpop.f32.mrb[7].mxu1 }
 0x13e   : > { %v957_v59 = vadd.f32 %v1397_v63, %v1357_v54  ;;  %v1400_v2 = vadd.f32 %v1399_v1, %v1398_v0  ;;  %v1361_v6 = vpop.f32.mrb[8].mxu0 }
 0x13f   : > { %v1362_v7 = vpop.f32.mrb[9].mxu0 }
 0x140   : > { %v1020_v3 = vadd.f32 %v1019_v52, %v957_v59  ;;  %v1034_v4 = vmul.f32 %v957_v59, %v957_v59  ;;  %v960_v5 = vadd.f32 %v1400_v2, %v1360_v61  ;;  %v1364_v12 = vpop.f32.mrb[10].mxu0  ;;  %v1363_v13 = vadd.f32 %v1362_v7, %v1361_v6 }
 0x141   : > { %v1365_v14 = vpop.f32.mrb[11].mxu0 }
 0x142   : > { %v1041_v8 = vadd.f32 %v1040_v56, %v1034_v4  ;;  %v1318_v9 = vpack.c.bf16 %v960_v5, %v957_v59  ;;  %v1021_v10 = vadd.f32 %v1020_v3, %v960_v5  ;;  %v1035_v11 = vmul.f32 %v960_v5, %v960_v5  ;;  %v1401_v17 = vpop.f32.mrb[8].mxu1 }
 0x143   : > { %v1366_v16 = vadd.f32 %v1365_v14, %v1364_v12  ;;  %v1402_v18 = vpop.f32.mrb[9].mxu1 }
 0x144   : > { %1330 = vst [vmem:[%s1944_s6 + $0x8] sm:$0xff] %v1318_v9   ;;  %v1042_v15 = vadd.f32 %v1041_v8, %v1035_v11  ;;  %v1403_v19 = vadd.f32 %v1402_v18, %v1401_v17  ;;  %v1404_v20 = vpop.f32.mrb[10].mxu1 }
 0x145   : > { %v1405_v21 = vpop.f32.mrb[11].mxu1 }
 0x146   : > { %v965_v22 = vadd.f32 %v1403_v19, %v1363_v13  ;;  %v1406_v23 = vadd.f32 %v1405_v21, %v1404_v20  ;;  %v1367_v24 = vpop.f32.mrb[12].mxu0 }
 0x147   : > { %v1368_v29 = vpop.f32.mrb[13].mxu0 }
 0x148   : > { %v1022_v25 = vadd.f32 %v1021_v10, %v965_v22  ;;  %v1036_v26 = vmul.f32 %v965_v22, %v965_v22  ;;  %v968_v27 = vadd.f32 %v1406_v23, %v1366_v16  ;;  %v1369_v30 = vadd.f32 %v1368_v29, %v1367_v24  ;;  %v1370_v31 = vpop.f32.mrb[14].mxu0 }
 0x149   : > { %v1371_v36 = vpop.f32.mrb[15].mxu0 }
 0x14a   : > { %v1043_v32 = vadd.f32 %v1042_v15, %v1036_v26  ;;  %v1323_v33 = vpack.c.bf16 %v968_v27, %v965_v22  ;;  %v1023_v34 = vadd.f32 %v1022_v25, %v968_v27  ;;  %v1037_v35 = vmul.f32 %v968_v27, %v968_v27  ;;  %v1407_v38 = vpop.f32.mrb[12].mxu1 }
 0x14b   : > { %v1372_v37 = vadd.f32 %v1371_v36, %v1370_v31  ;;  %v1408_v39 = vpop.f32.mrb[13].mxu1 }
 0x14c   : > { %1331 = vst [vmem:[%s1944_s6 + $0x10] sm:$0xff] %v1323_v33   ;;  %v1044_v28 = vadd.f32 %v1043_v32, %v1037_v35  ;;  %v1409_v40 = vadd.f32 %v1408_v39, %v1407_v38  ;;  %v1410_v41 = vpop.f32.mrb[14].mxu1 }
 0x14d   : > { %v1411_v42 = vpop.f32.mrb[15].mxu1 }
 0x14e   : > { %v973_v43 = vadd.f32 %v1409_v40, %v1369_v30  ;;  %v1412_v46 = vadd.f32 %v1411_v42, %v1410_v41 }
 0x150   : > { %v1024_v47 = vadd.f32 %v1023_v34, %v973_v43  ;;  %v1038_v60 = vmul.f32 %v973_v43, %v973_v43  ;;  %v976_v48 = vadd.f32 %v1412_v46, %v1372_v37 }
 0x152   : > { %v1045_v44 = vadd.f32 %v1044_v28, %v1038_v60  ;;  %v1328_v49 = vpack.c.bf16 %v976_v48, %v973_v43  ;;  %v1025_v50 = vadd.f32 %v1024_v47, %v976_v48  ;;  %v1039_v51 = vmul.f32 %v976_v48, %v976_v48 }
 0x154   : > { %1332 = vst [vmem:[%s1944_s6 + $0x18] sm:$0xff] %v1328_v49   ;;  %v1026_v52 = vrot.slane %v1025_v50, 4  ;;  %v1046_v45 = vadd.f32 %v1045_v44, %v1039_v51 }
 0x155   : > { %1570 = shalt.err (!%p1567_p6)
}
 0x156   : > { %s1571_s27 = scalar_lea.hbm %s1956_s11, 512  ;;  %s1575_s30 = scalar_lea.hbm %s2038_s2, 1024 }
 0x157   : > { %p1572_p7 = scmp.ne.s32.totalorder %s1956_s11, %s1571_s27  ;;  %p1576_p0 = scmp.lt.u32.totalorder %s1956_s11, %s2038_s2 }
 0x158   : > { %p1577_p2 = scmp.lt.u32.totalorder %s1575_s30, %s1571_s27  ;;  %p1579_p8 = scmp.lt.u32.totalorder %s1571_s27, %s1956_s11 }
 0x159   : > { %p1573_p9 = pnand %p1572_p7, %p2053_p10 }
 0x15a   : > { %p1578_p4 = por %p1577_p2, %p1576_p0 }
 0x15b   : > { %p1574_p12 = pneg %p1573_p9 }
 0x15c   : > { %p1580_p11 = por %p1579_p8, %p1578_p4 }
 0x15e   : > { %p1581_p13 = pnand %p1580_p11, %p1574_p12 }
 0x160   : > { %1584 = shalt.err (!%p1581_p13)
}
 0x161   : > { %s1677_s8 = smov 64   ;;  %s1678_s9 = smov 4   ;;  %v1027_v53 = vadd.f32 %v1026_v52, %v1025_v50  ;;  %v1047_v54 = vrot.slane %v1046_v45, 4  ;;  %vm1053_vm3 = vcmask 1040384  }
 0x162   : > { %1418 = dma.vmem_to_hbm [thread:$0]  (%p2053_p10), %s1951_s7, 512, %s1956_s11, %s1057_s18, %s1677_s8, %s1677_s8, %s1678_s9  }
 0x163   : > { %v1028_v55 = vrot.slane %v1027_v53, 2  ;;  %v1048_v56 = vadd.f32 %v1047_v54, %v1046_v45  ;;  %s1220_s10 = sshll.u32 %s1941_s4, 1  ;;  %s1298_s19 = sshll.u32 %s1663_s15, 5 }
 0x164   : > { %s205_s21 = scalar_lea.vmem [#allocation7], %s1220_s10  ;;  %s1988_s11 = scalar_lea.hbm %s2039_s3, %s1298_s19 }
 0x165   : > { %v1029_v57 = vadd.f32 %v1028_v55, %v1027_v53  ;;  %v1049_v58 = vrot.slane %v1048_v56, 2  ;;  %s1093_s23 = sshll.u32 %s205_s21, 4  ;;  %s1062_s18 = scalar_lea.sflag [#allocation8], %s1941_s4  ;;  %s1990_s23 = int_to_ptr.vmem [resolvable:$true] %s1093_s23 }
 0x166   : > { %s1585_s27 = scalar_lea.vmem %s1990_s23, 32  ;;  %s1679_s15 = smov [#allocation7]  }
 0x167   : > { %v1030_v61 = vrot.slane %v1029_v57, 1  ;;  %v1050_v62 = vadd.f32 %v1049_v58, %v1048_v56  ;;  %p1586_p1 = scmp.ne.s32.totalorder %s1990_s23, %s1585_s27  ;;  %s1589_s28 = sshll.u32 %s1679_s15, 4  ;;  %s1590_s28 = int_to_ptr.vmem [resolvable:$false] %s1589_s28 }
 0x168   : > { %s1591_s29 = scalar_lea.vmem %s1590_s28, 64  ;;  %p1592_p6 = scmp.lt.s32.totalorder %s1990_s23, %s1590_s28 }
 0x169   : > { %v1051_v63 = vrot.slane %v1050_v62, 1  ;;  %v1031_v0 = vadd.f32 %v1030_v61, %v1029_v57  ;;  %p1587_p3 = pnand %p1586_p1, %p2053_p10  ;;  %p1593_p7 = scmp.lt.s32.totalorder %s1591_s29, %s1585_s27 }
 0x16b   : > { %v1052_v1 = vadd.f32 %v1051_v63, %v1050_v62  ;;  %p1588_p5 = pneg %p1587_p3  ;;  %p1594_p9 = por %p1593_p7, %p1592_p6 }
 0x16d   : > { %v1054_v59 = vsel %vm1053_vm3, %v1031_v0, %v1052_v1  ;;  %p1595_p12 = pnand %p1594_p9, %p1588_p5 }
 0x16e   : > { %1055 = vst [vmem:[%s205_s21] sm:$0x3] %v1054_v59 }
 0x16f   : > { %1598 = shalt.err (!%p1595_p12)
}
 0x170   : > { %s1599_s4 = scalar_lea.hbm %s1988_s11, 32  ;;  %s1603_s6 = scalar_lea.hbm %s2039_s3, 64 }
 0x171   : > { %p1600_p0 = scmp.ne.s32.totalorder %s1988_s11, %s1599_s4  ;;  %p1604_p8 = scmp.lt.u32.totalorder %s1988_s11, %s2039_s3 }
 0x172   : > { %p1605_p11 = scmp.lt.u32.totalorder %s1603_s6, %s1599_s4  ;;  %p1607_p1 = scmp.lt.u32.totalorder %s1599_s4, %s1988_s11 }
 0x173   : > { %p1601_p2 = pnand %p1600_p0, %p2053_p10 }
 0x174   : > { %p1606_p13 = por %p1605_p11, %p1604_p8 }
 0x175   : > { %p1602_p4 = pneg %p1601_p2 }
 0x176   : > { %p1608_p3 = por %p1607_p1, %p1606_p13 }
 0x178   : > { %p1609_p5 = pnand %p1608_p3, %p1602_p4 }
 0x17a   : > { %1612 = shalt.err (!%p1609_p5)
}
 0x17b   : > { %1419 = dma.vmem_to_hbm [thread:$0]  (%p2053_p10), %s1990_s23, 32, %s1988_s11, %s1062_s18  }
 0x17c PF: > { %p1435_p6 = scmp.ge.s32.totalorder %s1671_s17, 2  ;;  %s1105_s10 = sand.u32 1, %s1651_s12  }
 0x17d   : > { %p2054_p7 = scmp.ne.s32.totalorder %s2045_s24, 0  ;;  %s1106_s19 = scalar_lea.sflag [#allocation5], %s1105_s10 }
 0x17f   : > { %p1427_p9 = pnand %p1435_p6, %p2054_p7 }
 0x181   : > { %1642 = dma.done.wait (!%p1427_p9), %s1106_s19, 512  }
 0x182   : > { %1644 = vsyncadd (!%p1427_p9), %s1106_s19, 4294966784  ;;  %s1115_s21 = scalar_lea.sflag [#allocation8], %s1105_s10 }
 0x183   : > { %1646 = dma.done.wait (!%p1427_p9), %s1115_s21, 32  }
 0x184   : > { %1648 = vsyncadd (!%p1427_p9), %s1115_s21, 4294967264  ;;  %s21_s17 = sadd.s32 1, %s1671_s17   ;;  %s2055_s12 = smov %s1655_s13 }
 0x185   : > { %p18_p12 = scmp.ge.s32.totalorder %s21_s17, 4   ;;  %s2056_s13 = smov %s1659_s14 }
 0x186   : > { %s2057_s14 = smov %s1753_s25  ;;  %s2058_s15 = smov %s1667_s16 }
 0x187   : > { %s2059_s16 = smov %s2061_s20  ;;  %20 = sbr.rel (!%p18_p12) target bundleno = 7 (0x7), region = 87 }
 0x18e   :  { %1120 = vsyncpa [#allocation4], 1 }
 0x18f   :  { %1122 = vsyncpa [#allocation4 + $0x1], 1 }
 0x190   :  { %1123 = vsyncpa [#allocation5], 1 }
 0x191   :  { %1125 = vsyncpa [#allocation5 + $0x1], 1 }
 0x192   :  { %1126 = vsyncpa [#allocation8], 1 }
 0x193   :  { %1128 = vsyncpa [#allocation8 + $0x1], 1 }

</bundles_post_ra>
